<compile_context>
chip_gen: v7x
topology: tpu7x:2x2x1
jax: 0.10.0
libtpu: 0.0.40
codegen_flags: <defaults>
</compile_context>

<pallas_src>
import jax
import jax.numpy as jnp
from jax.experimental import pallas as pl
from jax.experimental.pallas import tpu as pltpu


def titanic_mlp_kernel(x_ref,
                       w1_ref, b1_ref,
                       w2_ref, b2_ref,
                       w3_ref, b3_ref,
                       w4_ref, b4_ref,
                       o_ref):
    dt = x_ref.dtype  # compute dtype for the tanh chain (f32, or bf16 on v6e/v7x)

    # Layer 1: Linear(4, 16) + Tanh   -> (16, TB)
    h = jnp.dot(w1_ref[...], x_ref[...], preferred_element_type=jnp.float32) + b1_ref[...]
    h = jnp.tanh(h.astype(dt))
    # Layer 2: Linear(16, 32) + Tanh  -> (32, TB)
    h = jnp.dot(w2_ref[...], h, preferred_element_type=jnp.float32) + b2_ref[...]
    h = jnp.tanh(h.astype(dt))
    # Layer 3: Linear(32, 64) + Tanh  -> (64, TB)
    h = jnp.dot(w3_ref[...], h, preferred_element_type=jnp.float32) + b3_ref[...]
    h = jnp.tanh(h.astype(dt))
    # Dropout(p=0.5): identity in eval/inference mode.
    # TODO(synk): training-mode dropout (stochastic mask via pltpu.prng_*) not emitted.
    # Layer 4: Linear(64, 1) + Sigmoid -> (1, TB); reciprocal on the EUP approx path.
    z = jnp.dot(w4_ref[...], h, preferred_element_type=jnp.float32) + b4_ref[...]
    z = z.astype(jnp.float32)
    o_ref[...] = pl.reciprocal(1.0 + jnp.exp(-z), approx=True)


def titanic_forward(x, params, *, tile_b=None, compute_dtype=jnp.float32):
    """x: (batch, 4) f32.  params: W as (out, in), b as (out, 1).  Returns (batch, 1)."""
    batch, feat = x.shape
    if tile_b is None:
        # Largest lane-dense tile up to 1024 rows; per-block VMEM is a few hundred KiB,
        # safe under v7x's smaller VMEM budget while still amortizing per-step overhead.
        tile_b = min(1024, 128 * pl.cdiv(batch, 128))
    num_tiles = pl.cdiv(batch, tile_b)
    padded = num_tiles * tile_b

    # Batch-on-lanes layout: (4, padded_batch), zero-padded tail columns (tail safety).
    xT = jnp.zeros((feat, padded), x.dtype).at[:, :batch].set(x.T).astype(compute_dtype)
    (w1, b1, w2, b2, w3, b3, w4, b4) = (p.astype(compute_dtype) for p in params)

    resident = lambda shape: pl.BlockSpec(shape, lambda i: (0, 0))  # stays in VMEM

    out = pl.pallas_call(
        titanic_mlp_kernel,
        out_shape=jax.ShapeDtypeStruct((1, padded), jnp.float32),
        grid=(num_tiles,),
        in_specs=[
            pl.BlockSpec((feat, tile_b), lambda i: (0, i)),
            resident(w1.shape), resident(b1.shape),
            resident(w2.shape), resident(b2.shape),
            resident(w3.shape), resident(b3.shape),
            resident(w4.shape), resident(b4.shape),
        ],
        out_specs=pl.BlockSpec((1, tile_b), lambda i: (0, i)),
        compiler_params=pltpu.CompilerParams(dimension_semantics=("parallel",)),
    )(xT, w1, b1, w2, b2, w3, b3, w4, b4)

    return out[:, :batch].T  # back to (batch, 1)


def init_params(key):
    """Deterministic init mimicking nn.Linear (uniform(-1/sqrt(fan_in), +)).
    Stored as W: (out, in), b: (out, 1) for the batch-on-lanes kernel layout."""
    dims = [(4, 16), (16, 32), (32, 64), (64, 1)]
    params = []
    for fan_in, fan_out in dims:
        key, kw, kb = jax.random.split(key, 3)
        bound = 1.0 / jnp.sqrt(fan_in)
        w = jax.random.uniform(kw, (fan_out, fan_in), jnp.float32, -bound, bound)
        b = jax.random.uniform(kb, (fan_out, 1), jnp.float32, -bound, bound)
        params.extend([w, b])
    return tuple(params)


def reference_forward(x, params):
    (w1, b1, w2, b2, w3, b3, w4, b4) = params
    h = jnp.tanh(x @ w1.T + b1.T)
    h = jnp.tanh(h @ w2.T + b2.T)
    h = jnp.tanh(h @ w3.T + b3.T)
    return jax.nn.sigmoid(h @ w4.T + b4.T)


if __name__ == "__main__":
    key = jax.random.PRNGKey(0)
    key, kx = jax.random.split(key)
    batch = 8
    x = jax.random.normal(kx, (batch, 4), jnp.float32)  # 4 input features
    params = init_params(key)

    ref = reference_forward(x, params)

    # f32 activation path (default; the recommended path on v5e).
    out_f32 = jax.block_until_ready(titanic_forward(x, params))
    assert out_f32.shape == (batch, 1), out_f32.shape
    assert jnp.allclose(out_f32, ref, atol=1e-3, rtol=1e-3), (out_f32, ref)

    # bf16 activation path (recommended on v6e/v7x: the EUP tanh chain is the binding unit).
    out_bf16 = jax.block_until_ready(
        titanic_forward(x, params, compute_dtype=jnp.bfloat16))
    assert out_bf16.shape == (batch, 1), out_bf16.shape
    assert jnp.allclose(out_bf16, ref, atol=1e-1, rtol=1e-1), (out_bf16, ref)

    print("KERNEL_OK")
</pallas_src>

<mosaic_0001>
module attributes {stable_mosaic.version = 11 : i64} {
  func.func @titanic_mlp_kernel(%arg0: i32, %arg1: memref<4x128xf32, #tpu.memory_space<vmem>>, %arg2: memref<16x4xf32, #tpu.memory_space<vmem>>, %arg3: memref<16x1xf32, #tpu.memory_space<vmem>>, %arg4: memref<32x16xf32, #tpu.memory_space<vmem>>, %arg5: memref<32x1xf32, #tpu.memory_space<vmem>>, %arg6: memref<64x32xf32, #tpu.memory_space<vmem>>, %arg7: memref<64x1xf32, #tpu.memory_space<vmem>>, %arg8: memref<1x64xf32, #tpu.memory_space<vmem>>, %arg9: memref<1x1xf32, #tpu.memory_space<vmem>>, %arg10: memref<1x128xf32, #tpu.memory_space<vmem>>) attributes {dimension_semantics = [#tpu.dimension_semantics<parallel>], iteration_bounds = array<i64: 1>, scalar_prefetch = 0 : i64, scratch_operands = 0 : i64, tpu.core_type = #tpu.core_type<tc>, window_params = [{transform_indices = @transform_0, window_bounds = array<i64: 4, 128>}, {pipeline_mode = #tpu.pipeline_mode<synchronous>, transform_indices = @transform_1, window_bounds = array<i64: 16, 4>}, {pipeline_mode = #tpu.pipeline_mode<synchronous>, transform_indices = @transform_2, window_bounds = array<i64: 16, 1>}, {pipeline_mode = #tpu.pipeline_mode<synchronous>, transform_indices = @transform_3, window_bounds = array<i64: 32, 16>}, {pipeline_mode = #tpu.pipeline_mode<synchronous>, transform_indices = @transform_4, window_bounds = array<i64: 32, 1>}, {pipeline_mode = #tpu.pipeline_mode<synchronous>, transform_indices = @transform_5, window_bounds = array<i64: 64, 32>}, {pipeline_mode = #tpu.pipeline_mode<synchronous>, transform_indices = @transform_6, window_bounds = array<i64: 64, 1>}, {pipeline_mode = #tpu.pipeline_mode<synchronous>, transform_indices = @transform_7, window_bounds = array<i64: 1, 64>}, {pipeline_mode = #tpu.pipeline_mode<synchronous>, transform_indices = @transform_8, window_bounds = array<i64: 1, 1>}, {transform_indices = @transform_9, window_bounds = array<i64: 1, 128>}]} {
    %c0 = arith.constant 0 : index
    %c0_0 = arith.constant 0 : index
    %0 = vector.load %arg2[%c0, %c0_0] : memref<16x4xf32, #tpu.memory_space<vmem>>, vector<16x4xf32>
    %c0_1 = arith.constant 0 : index
    %c0_2 = arith.constant 0 : index
    %1 = vector.load %arg1[%c0_1, %c0_2] : memref<4x128xf32, #tpu.memory_space<vmem>>, vector<4x128xf32>
    %cst = arith.constant dense<0.000000e+00> : vector<16x128xf32>
    %2 = tpu.matmul %0, %1, %cst {dimension_numbers = #tpu.dot_dimension_numbers<[1], [0], [0], [1], [0, 0, 1, 1], [], []>} : vector<16x4xf32>, vector<4x128xf32>, vector<16x128xf32> -> vector<16x128xf32>
    %c0_3 = arith.constant 0 : index
    %c0_4 = arith.constant 0 : index
    %3 = vector.load %arg3[%c0_3, %c0_4] : memref<16x1xf32, #tpu.memory_space<vmem>>, vector<16x1xf32>
    %4 = vector.broadcast %3 : vector<16x1xf32> to vector<16x128xf32>
    %5 = arith.addf %2, %4 : vector<16x128xf32>
    %6 = math.tanh %5 : vector<16x128xf32>
    %c0_5 = arith.constant 0 : index
    %c0_6 = arith.constant 0 : index
    %7 = vector.load %arg4[%c0_5, %c0_6] : memref<32x16xf32, #tpu.memory_space<vmem>>, vector<32x16xf32>
    %cst_7 = arith.constant dense<0.000000e+00> : vector<32x128xf32>
    %8 = tpu.matmul %7, %6, %cst_7 {dimension_numbers = #tpu.dot_dimension_numbers<[1], [0], [0], [1], [0, 0, 1, 1], [], []>} : vector<32x16xf32>, vector<16x128xf32>, vector<32x128xf32> -> vector<32x128xf32>
    %c0_8 = arith.constant 0 : index
    %c0_9 = arith.constant 0 : index
    %9 = vector.load %arg5[%c0_8, %c0_9] : memref<32x1xf32, #tpu.memory_space<vmem>>, vector<32x1xf32>
    %10 = vector.broadcast %9 : vector<32x1xf32> to vector<32x128xf32>
    %11 = arith.addf %8, %10 : vector<32x128xf32>
    %12 = math.tanh %11 : vector<32x128xf32>
    %c0_10 = arith.constant 0 : index
    %c0_11 = arith.constant 0 : index
    %13 = vector.load %arg6[%c0_10, %c0_11] : memref<64x32xf32, #tpu.memory_space<vmem>>, vector<64x32xf32>
    %cst_12 = arith.constant dense<0.000000e+00> : vector<64x128xf32>
    %14 = tpu.matmul %13, %12, %cst_12 {dimension_numbers = #tpu.dot_dimension_numbers<[1], [0], [0], [1], [0, 0, 1, 1], [], []>} : vector<64x32xf32>, vector<32x128xf32>, vector<64x128xf32> -> vector<64x128xf32>
    %c0_13 = arith.constant 0 : index
    %c0_14 = arith.constant 0 : index
    %15 = vector.load %arg7[%c0_13, %c0_14] : memref<64x1xf32, #tpu.memory_space<vmem>>, vector<64x1xf32>
    %16 = vector.broadcast %15 : vector<64x1xf32> to vector<64x128xf32>
    %17 = arith.addf %14, %16 : vector<64x128xf32>
    %18 = math.tanh %17 : vector<64x128xf32>
    %c0_15 = arith.constant 0 : index
    %c0_16 = arith.constant 0 : index
    %19 = vector.load %arg8[%c0_15, %c0_16] : memref<1x64xf32, #tpu.memory_space<vmem>>, vector<1x64xf32>
    %cst_17 = arith.constant dense<0.000000e+00> : vector<1x128xf32>
    %20 = tpu.matmul %19, %18, %cst_17 {dimension_numbers = #tpu.dot_dimension_numbers<[1], [0], [0], [1], [0, 0, 1, 1], [], []>} : vector<1x64xf32>, vector<64x128xf32>, vector<1x128xf32> -> vector<1x128xf32>
    %c0_18 = arith.constant 0 : index
    %c0_19 = arith.constant 0 : index
    %21 = vector.load %arg9[%c0_18, %c0_19] : memref<1x1xf32, #tpu.memory_space<vmem>>, vector<1x1xf32>
    %22 = vector.broadcast %21 : vector<1x1xf32> to vector<1x128xf32>
    %23 = arith.addf %20, %22 : vector<1x128xf32>
    %cst_20 = arith.constant 0.000000e+00 : f32
    %24 = vector.broadcast %cst_20 : f32 to vector<1x128xf32>
    %25 = arith.subf %24, %23 : vector<1x128xf32>
    %26 = math.exp %25 : vector<1x128xf32>
    %cst_21 = arith.constant 1.000000e+00 : f32
    %27 = vector.broadcast %cst_21 : f32 to vector<1x128xf32>
    %28 = arith.addf %27, %26 : vector<1x128xf32>
    %29 = tpu.reciprocal %28 {approx = true} : vector<1x128xf32> -> vector<1x128xf32>
    %c0_22 = arith.constant 0 : index
    %c0_23 = arith.constant 0 : index
    %30 = vector.load %arg10[%c0_22, %c0_23] : memref<1x128xf32, #tpu.memory_space<vmem>>, vector<1x128xf32>
    tpu.vector_store %arg10[%c0_22, %c0_23], %29 {strides = array<i32>} : memref<1x128xf32, #tpu.memory_space<vmem>>, vector<1x128xf32>,
    return
  }
  func.func @transform_0(%arg0: i32) -> (i32, i32) {
    %c0_i32 = arith.constant 0 : i32
    %c0_i32_0 = arith.constant 0 : i32
    return %c0_i32, %arg0 : i32, i32
  }
  func.func @transform_1(%arg0: i32) -> (i32, i32) {
    %c0_i32 = arith.constant 0 : i32
    %c0_i32_0 = arith.constant 0 : i32
    %c0_i32_1 = arith.constant 0 : i32
    return %c0_i32, %c0_i32_0 : i32, i32
  }
  func.func @transform_2(%arg0: i32) -> (i32, i32) {
    %c0_i32 = arith.constant 0 : i32
    %c0_i32_0 = arith.constant 0 : i32
    %c0_i32_1 = arith.constant 0 : i32
    return %c0_i32, %c0_i32_0 : i32, i32
  }
  func.func @transform_3(%arg0: i32) -> (i32, i32) {
    %c0_i32 = arith.constant 0 : i32
    %c0_i32_0 = arith.constant 0 : i32
    %c0_i32_1 = arith.constant 0 : i32
    return %c0_i32, %c0_i32_0 : i32, i32
  }
  func.func @transform_4(%arg0: i32) -> (i32, i32) {
    %c0_i32 = arith.constant 0 : i32
    %c0_i32_0 = arith.constant 0 : i32
    %c0_i32_1 = arith.constant 0 : i32
    return %c0_i32, %c0_i32_0 : i32, i32
  }
  func.func @transform_5(%arg0: i32) -> (i32, i32) {
    %c0_i32 = arith.constant 0 : i32
    %c0_i32_0 = arith.constant 0 : i32
    %c0_i32_1 = arith.constant 0 : i32
    return %c0_i32, %c0_i32_0 : i32, i32
  }
  func.func @transform_6(%arg0: i32) -> (i32, i32) {
    %c0_i32 = arith.constant 0 : i32
    %c0_i32_0 = arith.constant 0 : i32
    %c0_i32_1 = arith.constant 0 : i32
    return %c0_i32, %c0_i32_0 : i32, i32
  }
  func.func @transform_7(%arg0: i32) -> (i32, i32) {
    %c0_i32 = arith.constant 0 : i32
    %c0_i32_0 = arith.constant 0 : i32
    %c0_i32_1 = arith.constant 0 : i32
    return %c0_i32, %c0_i32_0 : i32, i32
  }
  func.func @transform_8(%arg0: i32) -> (i32, i32) {
    %c0_i32 = arith.constant 0 : i32
    %c0_i32_0 = arith.constant 0 : i32
    %c0_i32_1 = arith.constant 0 : i32
    return %c0_i32, %c0_i32_0 : i32, i32
  }
  func.func @transform_9(%arg0: i32) -> (i32, i32) {
    %c0_i32 = arith.constant 0 : i32
    %c0_i32_0 = arith.constant 0 : i32
    return %c0_i32, %arg0 : i32, i32
  }
}

</mosaic_0001>

<bundles_post_ra>
// kernel: tpu_custom_call.1
= control target key start
LH: loop header
LB: loop body
LE: loop exit
PB: predicated region body
PF: predicated region fallthrough
CT: control target
= control target key end

     0   :  { %s926_s0 = inlined_call_operand.vmem [shape: f32[4,128], index: 0, kind: input, shape index: {}]   ;;  %s927_s1 = inlined_call_operand.vmem [shape: f32[16,4], index: 1, kind: input, shape index: {}]   ;;  %s928_s2 = inlined_call_operand.vmem [shape: f32[16,1], index: 2, kind: input, shape index: {}]   ;;  %s929_s3 = inlined_call_operand.vmem [shape: f32[32,16], index: 3, kind: input, shape index: {}]   ;;  %s930_s4 = inlined_call_operand.vmem [shape: f32[32,1], index: 4, kind: input, shape index: {}]   ;;  %s931_s5 = inlined_call_operand.vmem [shape: f32[64,32], index: 5, kind: input, shape index: {}]   ;;  %s932_s6 = inlined_call_operand.vmem [shape: f32[64,1], index: 6, kind: input, shape index: {}]   ;;  %s933_s7 = inlined_call_operand.vmem [shape: f32[1,64], index: 7, kind: input, shape index: {}]   ;;  %s934_s8 = inlined_call_operand.<no memory space> [shape: f32[1,1], index: 8, kind: input, shape index: {}]   ;;  %s935_s9 = inlined_call_operand.hbm [shape: f32[1,128], index: 9, kind: output, shape index: {}]  }
   0x1   :  { %v14_v0 = vstv %s934_s8 }
   0x2   :  { %15 = vst [vmem:[#allocation2] sm:$0x1] %v14_v0 }
   0x3   :  { %v37_v1 = vld [vmem:[%s926_s0] sm:$0xf]  ;;  %vm57_vm0 = vcmask 1043456   ;;  %vm50_vm1 = vcmask 31744   ;;  %v36_v3 = vld [vmem:[%s927_s1 + $0x8] sm:$0xff]  ;;  %v754_v5 = vmov 0  }
   0x4   :  { %v35_v2 = vld [vmem:[%s927_s1] sm:$0xff]  ;;  %613 = vmatprep.subr.msk.mxu0 %vm57_vm0, %v37_v1  ;;  %696 = vset.pattern.permute.xlu0 %v754_v5 }
   0x5   :  { %615 = vmatprep.mubr.msk.f32.mxu0 %vm50_vm1, %v35_v2  ;;  %v38_v4 = vld [vmem:[%s928_s2] sm:$0xff]  ;;  %614 = vmatpush3.msk.msra.mxu0 %vm57_vm0, %v37_v1 }
   0x6   :  { %616 = vmatmul.mubr.msk.f32.vlgmr.msra.gmra.mrb[0].mxu0 %vm50_vm1, %v36_v3  ;;  %42 = vperm.xlu0 %696, %v38_v4  }
   0x7   :  { %16 = vsyncpa [#allocation4], 0  ;;  %v39_v6 = vld [vmem:[%s928_s2 + $0x8] sm:$0xff]  ;;  %697 = vset.pattern.permute.xlu1 %v754_v5  ;;  %v144_v7 = vld [vmem:[%s930_s4 + $0x10] sm:$0xff]  ;;  %vm166_vm2 = vcmask 130048   ;;  %vm324_vm3 = vcmask 261120  }
   0x8   :  { %v276_v8 = vld [vmem:[%s932_s6] sm:$0xff]  ;;  %v278_v9 = vld [vmem:[%s932_s6 + $0x10] sm:$0xff]  ;;  %v143_v15 = vld [vmem:[%s930_s4 + $0x8] sm:$0xff]  ;;  %v755_v59 = vmov 0.0|0.0   ;;  %vm756_vm4 = vmmov 0   ;;  %v757_v60 = vmov 0.0  }
   0x9   :  { %v280_v10 = vld [vmem:[%s932_s6 + $0x20] sm:$0xff]  ;;  %v282_v11 = vld [vmem:[%s932_s6 + $0x30] sm:$0xff]  ;;  %v145_v16 = vld [vmem:[%s930_s4 + $0x18] sm:$0xff]  ;;  %vm473_vm5 = vcmask 523264   ;;  %s758_s17 = smov [#allocation3]  }
   0xa   :  { %47 = vperm.xlu0 %696, %v39_v6   ;;  %v463_v12 = vld [vmem:[#allocation2] sm:$0x1]  ;;  %v277_v17 = vld [vmem:[%s932_s6 + $0x8] sm:$0xff]  ;;  %v279_v18 = vld [vmem:[%s932_s6 + $0x18] sm:$0xff]  ;;  %s559_s18 = sshll.u32 %s758_s17, 4  ;;  %s560_s18 = int_to_ptr.vmem [resolvable:$true] %s559_s18 }
   0xb   :  { %v138_v13 = vld [vmem:[%s929_s3] sm:$0xff]  ;;  %v281_v19 = vld [vmem:[%s932_s6 + $0x28] sm:$0xff]  ;;  %v283_v20 = vld [vmem:[%s932_s6 + $0x38] sm:$0xff]  ;;  %s734_s0 = scalar_lea.vmem %s560_s18, 32  ;;  %p735_p1 = scmp.lt.s32.totalorder %s560_s18, %s560_s18 }
   0xc   :  { %622 = vmatprep.mubr.msk.f32.mxu1 %vm166_vm2, %v138_v13  ;;  %v142_v14 = vld [vmem:[%s930_s4] sm:$0xff]  ;;  %v139_v30 = vld [vmem:[%s929_s3 + $0x8] sm:$0xff]  ;;  %v140_v31 = vld [vmem:[%s929_s3 + $0x10] sm:$0xff] }
   0xd   :  { %148 = vperm.xlu1 %697, %v142_v14   ;;  %v141_v32 = vld [vmem:[%s929_s3 + $0x18] sm:$0xff]  ;;  %v268_v33 = vld [vmem:[%s931_s5] sm:$0xff]  ;;  %v269_v52 = vld [vmem:[%s931_s5 + $0x8] sm:$0xff] }
   0xe   :  { %158 = vperm.xlu0 %696, %v144_v7   ;;  %636 = vmatprep.mubr.msk.f32.mxu0 %vm324_vm3, %v268_v33  ;;  %v270_v53 = vld [vmem:[%s931_s5 + $0x10] sm:$0xff]  ;;  %v271_v54 = vld [vmem:[%s931_s5 + $0x18] sm:$0xff]  ;;  %v272_v55 = vld [vmem:[%s931_s5 + $0x20] sm:$0xff] }
   0xf   :  { %v273_v56 = vld [vmem:[%s931_s5 + $0x28] sm:$0xff]  ;;  %v274_v57 = vld [vmem:[%s931_s5 + $0x30] sm:$0xff]  ;;  %v275_v58 = vld [vmem:[%s931_s5 + $0x38] sm:$0xff] }
  0x10   :  { %v462_v33 = vld [vmem:[%s933_s7] sm:$0x1]  ;;  %s730_s7 = scalar_lea.vmem %s560_s18, 16 }
  0x11   :  { %153 = vperm.xlu1 %697, %v143_v15   ;;  %p731_p0 = scmp.ne.s32.totalorder %s560_s18, %s730_s7  ;;  %p736_p2 = scmp.lt.s32.totalorder %s734_s0, %s730_s7 }
  0x12   :  { %286 = vperm.xlu0 %696, %v276_v8  }
  0x13   :  { %p737_p3 = por %p736_p2, %p735_p1 }
  0x15   :  { %163 = vperm.xlu1 %697, %v145_v16   ;;  %p738_p4 = pnand %p737_p3, %p731_p0 }
  0x16   :  { %296 = vperm.xlu0 %696, %v278_v9  }
  0x19   :  { %291 = vperm.xlu1 %697, %v277_v17  }
  0x1a   :  { %306 = vperm.xlu0 %696, %v280_v10  }
  0x1d   :  { %301 = vperm.xlu1 %697, %v279_v18  }
  0x1e   :  { %316 = vperm.xlu0 %696, %v282_v11  }
  0x21   :  { %311 = vperm.xlu1 %697, %v281_v19  }
  0x22   :  { %466 = vperm.xlu0 %696, %v463_v12  }
  0x25   :  { %321 = vperm.xlu1 %697, %v283_v20  }
  0x85   :  { %v43_v21 = vpop.permute.xlu0 %42 }
  0x89   :  { %v48_v22 = vpop.permute.xlu0 %47 }
  0x8c   :  { %v149_v34 = vpop.permute.xlu1 %148 }
  0x8d   :  { %v159_v42 = vpop.permute.xlu0 %158 }
  0x90   :  { %v154_v35 = vpop.permute.xlu1 %153 }
  0x91   :  { %v287_v62 = vpop.permute.xlu0 %286 }
  0x94   :  { %v164_v40 = vpop.permute.xlu1 %163 }
  0x95   :  { %v297_v1 = vpop.permute.xlu0 %296 }
  0x98   :  { %v292_v61 = vpop.permute.xlu1 %291 }
  0x99   :  { %v307_v10 = vpop.permute.xlu0 %306 }
  0x9c   :  { %v302_v63 = vpop.permute.xlu1 %301 }
  0x9d   :  { %v317_v18 = vpop.permute.xlu0 %316 }
  0xa0   :  { %v312_v8 = vpop.permute.xlu1 %311 }
  0xa4   :  { %v322_v15 = vpop.permute.xlu1 %321 }
  0xd9   :  { %v617_v23 = vpop.f32.mrb[0].mxu0 }
  0xda   :  { %v133_v24 = vadd.f32 %v617_v23, %v48_v22  ;;  %v127_v25 = vpop.f32.mrb[1].mxu0 }
  0xdb   :  { %v128_v26 = vadd.f32 %v127_v25, %v43_v21 }
  0xdc   :  { %698 = vtanh.f32 %v133_v24 }
  0xdd   :  { %700 = vtanh.f32 %v128_v26 }
  0xe6   :  { %v699_v27 = vpop.eup %698 }
  0xe7   :  { %v701_v28 = vpop.eup %700 }
  0xe8   :  { %v667_v29 = vpack.c.bf16 %v699_v27, %v701_v28 }
  0xea   :  { %668 = vmatprep.subr.bf16.mxu1 %v667_v29 }
  0xeb   :  { %670 = vmatpush3.bf16.msra.mxu1 %v667_v29 }
  0xec   :  { %679 = vmatprep.subr.bf16.mxu1 %v755_v59 }
  0xee   :  { %623 = vmatmul.mubr.msk.f32.vlgmr.msra.gmra.mrb[0].mxu1 %vm166_vm2, %v139_v30 }
  0xef   :  { %625 = vmatprep.mubr.msk.f32.mxu1 %vm166_vm2, %v140_v31 }
  0xf2   :  { %626 = vmatmul.mubr.msk.f32.gmra.mrb[2].mxu1 %vm166_vm2, %v141_v32 }
  0xf3   :  { %664 = vmatprep.mubr.msk.f32.mxu1 %vm756_vm4, %v757_v60 }
 0x1c1   :  { %v624_v36 = vpop.f32.mrb[0].mxu1 }
 0x1c2   :  { %v251_v37 = vadd.f32 %v624_v36, %v154_v35  ;;  %v245_v38 = vpop.f32.mrb[1].mxu1 }
 0x1c3   :  { %v246_v39 = vadd.f32 %v245_v38, %v149_v34  ;;  %v469_v34 = vlaneseq }
 0x1c4   :  { %702 = vtanh.f32 %v251_v37  ;;  %v467_v37 = vpop.permute.xlu0 %466 }
 0x1c5   :  { %704 = vtanh.f32 %v246_v39  ;;  %v627_v41 = vpop.f32.mrb[2].mxu1  ;;  %v470_v35 = vshrl.u32 %v469_v34, 7 }
 0x1c6   :  { %v261_v43 = vadd.f32 %v627_v41, %v164_v40  ;;  %v255_v44 = vpop.f32.mrb[3].mxu1 }
 0x1c7   :  { %v256_v45 = vadd.f32 %v255_v44, %v159_v42  ;;  %v471_v36 = vsub.s32 0, %v470_v35 }
 0x1c8   :  { %706 = vtanh.f32 %v261_v43 }
 0x1c9   :  { %708 = vtanh.f32 %v256_v45  ;;  %v472_v38 = vrot.slane %v467_v37, %v471_v36 }
 0x1ce   :  { %v703_v46 = vpop.eup %702 }
 0x1cf   :  { %v705_v47 = vpop.eup %704 }
 0x1d0   :  { %v671_v48 = vpack.c.bf16 %v703_v46, %v705_v47 }
 0x1d2   :  { %v707_v49 = vpop.eup %706  ;;  %672 = vmatprep.subr.bf16.mxu0 %v671_v48 }
 0x1d3   :  { %v709_v50 = vpop.eup %708  ;;  %674 = vmatpush3.bf16.msra.mxu0 %v671_v48 }
 0x1d4   :  { %v675_v51 = vpack.c.bf16 %v707_v49, %v709_v50 }
 0x1d6   :  { %676 = vmatprep.subr.bf16.mxu0 %v675_v51 }
 0x1d7   :  { %678 = vmatpush3.bf16.msra.mxu0 %v675_v51 }
 0x1da   :  { %637 = vmatmul.mubr.msk.f32.vlgmr.msra.gmra.mrb[2].mxu0 %vm324_vm3, %v269_v52 }
 0x1db   :  { %639 = vmatprep.mubr.msk.f32.mxu0 %vm324_vm3, %v270_v53 }
 0x1de   :  { %640 = vmatmul.mubr.msk.f32.gmra.mrb[4].mxu0 %vm324_vm3, %v271_v54 }
 0x1df   :  { %642 = vmatprep.mubr.msk.f32.mxu0 %vm324_vm3, %v272_v55 }
 0x1e2   :  { %643 = vmatmul.mubr.msk.f32.gmra.mrb[6].mxu0 %vm324_vm3, %v273_v56 }
 0x1e3   :  { %645 = vmatprep.mubr.msk.f32.mxu0 %vm324_vm3, %v274_v57 }
 0x1e6   :  { %646 = vmatmul.mubr.msk.f32.gmra.mrb[8].mxu0 %vm324_vm3, %v275_v58 }
 0x2ad   :  { %v638_v0 = vpop.f32.mrb[2].mxu0 }
 0x2ae   :  { %v421_v2 = vadd.f32 %v638_v0, %v292_v61  ;;  %v415_v3 = vpop.f32.mrb[3].mxu0 }
 0x2af   :  { %v416_v4 = vadd.f32 %v415_v3, %v287_v62 }
 0x2b0   :  { %710 = vtanh.f32 %v421_v2 }
 0x2b1   :  { %712 = vtanh.f32 %v416_v4  ;;  %v641_v5 = vpop.f32.mrb[4].mxu0 }
 0x2b2   :  { %v431_v6 = vadd.f32 %v641_v5, %v302_v63  ;;  %v425_v7 = vpop.f32.mrb[5].mxu0 }
 0x2b3   :  { %v426_v9 = vadd.f32 %v425_v7, %v297_v1 }
 0x2b4   :  { %714 = vtanh.f32 %v431_v6 }
 0x2b5   :  { %716 = vtanh.f32 %v426_v9  ;;  %v644_v11 = vpop.f32.mrb[6].mxu0 }
 0x2b6   :  { %v441_v12 = vadd.f32 %v644_v11, %v312_v8  ;;  %v435_v13 = vpop.f32.mrb[7].mxu0 }
 0x2b7   :  { %v436_v14 = vadd.f32 %v435_v13, %v307_v10 }
 0x2b8   :  { %718 = vtanh.f32 %v441_v12 }
 0x2b9   :  { %720 = vtanh.f32 %v436_v14  ;;  %v647_v16 = vpop.f32.mrb[8].mxu0 }
 0x2ba   :  { %v711_v17 = vpop.eup %710  ;;  %v451_v19 = vadd.f32 %v647_v16, %v322_v15  ;;  %v445_v20 = vpop.f32.mrb[9].mxu0 }
 0x2bb   :  { %v713_v21 = vpop.eup %712  ;;  %v446_v22 = vadd.f32 %v445_v20, %v317_v18 }
 0x2bc   :  { %722 = vtanh.f32 %v451_v19  ;;  %v680_v23 = vpack.c.bf16 %v711_v17, %v713_v21 }
 0x2bd   :  { %724 = vtanh.f32 %v446_v22 }
 0x2be   :  { %v715_v24 = vpop.eup %714  ;;  %681 = vmatpush3.bf16.msra.mxu1 %v680_v23 }
 0x2bf   :  { %v717_v25 = vpop.eup %716  ;;  %682 = vmatprep.subr.bf16.mxu1 %v755_v59 }
 0x2c0   :  { %v683_v26 = vpack.c.bf16 %v715_v24, %v717_v25 }
 0x2c2   :  { %v719_v27 = vpop.eup %718  ;;  %684 = vmatpush3.bf16.msra.mxu1 %v683_v26 }
 0x2c3   :  { %v721_v28 = vpop.eup %720  ;;  %685 = vmatprep.subr.bf16.mxu1 %v755_v59 }
 0x2c4   :  { %v686_v29 = vpack.c.bf16 %v719_v27, %v721_v28 }
 0x2c6   :  { %v723_v30 = vpop.eup %722  ;;  %687 = vmatpush3.bf16.msra.mxu1 %v686_v29 }
 0x2c7   :  { %v725_v31 = vpop.eup %724  ;;  %688 = vmatprep.subr.bf16.mxu1 %v755_v59 }
 0x2c8   :  { %v689_v32 = vpack.c.bf16 %v723_v30, %v725_v31 }
 0x2ca   :  { %690 = vmatpush3.bf16.msra.mxu1 %v689_v32 }
 0x2cd   :  { %665 = vmatmul.mubr.msk.f32.vlgmr.msra.gmra.mrb[4].mxu1 %vm473_vm5, %v462_v33 }
 0x3a0   :  { %v543_v39 = vpop.f32.mrb[4].mxu1 }
 0x3a1   :  { %v544_v40 = vadd.f32 %v543_v39, %v472_v38  ;;  %v666_v41 = vpop.f32.mrb[5].mxu1 }
 0x3a3   :  { %v547_v42 = vsub.f32 0.0, %v544_v40 }
 0x3a5   :  { %v548_v43 = vmul.f32 1.442695, %v547_v42 }
 0x3a7   :  { %726 = vpow2.f32 %v548_v43 }
 0x3b1   :  { %v727_v44 = vpop.eup %726 }
 0x3b2   :  { %v550_v45 = vadd.f32 1.0, %v727_v44 }
 0x3b4   :  { %728 = vrcp.f32 %v550_v45 }
 0x3be   :  { %v729_v46 = vpop.eup %728 }
 0x3bf   :  { %552 = vst [vmem:[#allocation3] sm:$0x1] %v729_v46 }
 0x3c0   :  { %741 = shalt.err (!%p738_p4)
}
 0x3c1   :  { %s742_s4 = scalar_lea.hbm %s935_s9, 16 }
 0x3c2   :  { %p743_p5 = scmp.ne.s32.totalorder %s935_s9, %s742_s4  ;;  %p746_p6 = scmp.lt.u32.totalorder %s742_s4, %s935_s9 }
 0x3c4   :  { %p748_p7 = pnand %p746_p6, %p743_p5 }
 0x3c6   :  { %751 = shalt.err (!%p748_p7)
}
 0x3c7   :  { %562 = dma.vmem_to_hbm [thread:$0]  %s560_s18, 16, %s935_s9, [#allocation4]  }
 0x3c8   :  { %752 = dma.done.wait [#allocation4], 16  }
 0x3c9   :  { %753 = vsyncadd [#allocation4], 4294967280 }
 0x3ca   :  { %566 = vsyncpa [#allocation4], 1 }

</bundles_post_ra>
